<compile_context>
chip_gen: v7x
topology: tpu7x:2x2x1
jax: 0.10.0
libtpu: 0.0.40
codegen_flags: <defaults>
</compile_context>

<pallas_src>
import functools
from typing import NamedTuple

import jax
import jax.numpy as jnp
import numpy as np
from jax import lax
from jax.experimental import pallas as pl
from jax.experimental.pallas import tpu as pltpu

BN_EPS = 1e-5


def _round_up(n, m):
    return (n + m - 1) // m * m


def _vmem_capacity_bytes():
    """Physical VMEM per core; conservative fallback if the query fails."""
    try:
        info = pltpu.get_tpu_info()
        cap = getattr(info, "vmem_capacity_bytes", None)
        if cap:
            return int(cap)
    except Exception:
        pass
    return 64 * 1024 * 1024  # v7x per-TC size; safe lower bound everywhere


# ---------------------------------------------------------------------------
# Fused kernel: BatchNorm1d (training-mode batch stats) + fc1 + fc2-tile
# ---------------------------------------------------------------------------

def fused_kernel(x_ref, gamma_ref, beta_ref, w1t_ref, b1_ref,
                 w2t_ref, b2_ref, o_ref):
    """One grid step computes one wide output tile of fc2.

    x_ref:     [B, D]    whole batch, VMEM-resident (constant block index)
    gamma_ref: [1, D]    BN weight
    beta_ref:  [1, D]    BN bias
    w1t_ref:   [D, Hp]   fc1 weight, pre-transposed + zero-padded (f32)
    b1_ref:    [1, Hp]   fc1 bias (zero-padded, f32)
    w2t_ref:   [Hp, TN]  fc2 weight tile, pre-transposed (bf16 or f32 stream)
    b2_ref:    [1, TN]   fc2 bias tile (f32)
    o_ref:     [B, TN]   output tile (f32)
    """
    # --- BN + fc1, recomputed per step (negligible; hides under weight DMA) ---
    x = x_ref[...]
    mean = jnp.mean(x, axis=0, keepdims=True)
    var = jnp.mean((x - mean) ** 2, axis=0, keepdims=True)   # biased variance
    xn = (x - mean) * lax.rsqrt(var + BN_EPS)
    xn = xn * gamma_ref[...] + beta_ref[...]
    h = jnp.dot(xn, w1t_ref[...], preferred_element_type=jnp.float32) + b1_ref[...]

    # --- fc2 tile: upcast the streamed weight tile; keep activations in f32 ---
    w2 = w2t_ref[...].astype(jnp.float32)
    o_ref[...] = jnp.dot(h, w2, preferred_element_type=jnp.float32) + b2_ref[...]


# ---------------------------------------------------------------------------
# One-time parameter preparation (outside the per-forward hot path)
# ---------------------------------------------------------------------------

class PreparedParams(NamedTuple):
    gamma: jax.Array   # [1, D]
    beta: jax.Array    # [1, D]
    w1t: jax.Array     # [D, Hp]  f32
    b1: jax.Array      # [1, Hp]  f32
    w2t: jax.Array     # [Hp, Op] streaming dtype (bf16 default)
    b2: jax.Array      # [1, Op]  f32


def _pick_out_tiling(out_size, hp, batch, w_bytes, vmem_budget):
    """Pad O to a multiple of 128 and pick tn as a 128-multiple divisor tile.

    Prefer the smallest step count that is even and >= 8 (balanced split on
    v7x's two TensorCores) whose double-buffered tile fits the VMEM budget;
    otherwise fall back to the smallest fitting step count.
    """
    op = _round_up(out_size, 128)
    nblocks = op // 128

    def fits(tn):
        need = 2 * (hp * tn * w_bytes + tn * 4) + 2 * (batch * tn * 4)
        return need <= vmem_budget

    divisors = [d for d in range(1, nblocks + 1) if nblocks % d == 0]
    preferred = [d for d in divisors if d % 2 == 0 and d >= 8]
    for d in preferred + divisors:
        tn = (nblocks // d) * 128
        if fits(tn):
            return op, tn
    return op, 128


def prepare_params(params, *, batch_hint=8, w2_dtype=jnp.bfloat16):
    """Transpose + pad the weights ONCE (keeps the ~11-21 MB w2 transpose out
    of the per-forward hot path)."""
    gamma, beta, w1, b1, w2, b2 = params
    H, D = w1.shape
    O = w2.shape[0]

    w_bytes = jnp.dtype(w2_dtype).itemsize
    h_mult = {4: 8, 2: 16, 1: 32}.get(w_bytes, 8)   # sublane packing granularity
    Hp = _round_up(H, h_mult)                        # 100 -> 104 (f32) / 112 (bf16)

    vmem_cap = _vmem_capacity_bytes()
    Op, tn = _pick_out_tiling(O, Hp, batch_hint, w_bytes, vmem_cap // 4)
    vmem_limit = int(vmem_cap // 2)

    w1t = jnp.zeros((D, Hp), jnp.float32).at[:, :H].set(w1.T)
    b1p = jnp.zeros((1, Hp), jnp.float32).at[:, :H].set(b1)
    w2t = jnp.zeros((Hp, Op), w2_dtype).at[:H, :O].set(w2.T.astype(w2_dtype))
    b2p = jnp.zeros((1, Op), jnp.float32).at[:, :O].set(b2)

    prep = PreparedParams(
        gamma.reshape(1, D).astype(jnp.float32),
        beta.reshape(1, D).astype(jnp.float32),
        w1t, b1p, w2t, b2p,
    )
    return prep, O, tn, vmem_limit


# ---------------------------------------------------------------------------
# Forward pass
# ---------------------------------------------------------------------------

@functools.partial(jax.jit, static_argnames=("out_size", "tn", "vmem_limit"))
def neural_net_forward(x, prep, *, out_size, tn, vmem_limit):
    B, D = x.shape
    Hp = prep.w1t.shape[1]
    Op = prep.w2t.shape[1]
    assert Op % tn == 0  # guaranteed by prepare_params
    nsteps = Op // tn

    w_bytes = jnp.dtype(prep.w2t.dtype).itemsize
    cost = pl.CostEstimate(
        flops=2 * B * Hp * Op + nsteps * 2 * B * D * Hp,
        transcendentals=nsteps * D,
        bytes_accessed=(Hp * Op * w_bytes + B * Op * 4 + Op * 4
                        + B * D * 4 + D * Hp * 4 + 2 * D * 4 + Hp * 4),
    )

    out = pl.pallas_call(
        fused_kernel,
        out_shape=jax.ShapeDtypeStruct((B, Op), jnp.float32),
        grid_spec=pltpu.PrefetchScalarGridSpec(
            num_scalar_prefetch=0,
            grid=(nsteps,),
            in_specs=[
                pl.BlockSpec((B, D), lambda j: (0, 0)),     # x (resident)
                pl.BlockSpec((1, D), lambda j: (0, 0)),     # gamma
                pl.BlockSpec((1, D), lambda j: (0, 0)),     # beta
                pl.BlockSpec((D, Hp), lambda j: (0, 0)),    # w1t (resident)
                pl.BlockSpec((1, Hp), lambda j: (0, 0)),    # b1
                pl.BlockSpec((Hp, tn), lambda j: (0, j)),   # w2t tile (streamed)
                pl.BlockSpec((1, tn), lambda j: (0, j)),    # b2 tile
            ],
            out_specs=pl.BlockSpec((B, tn), lambda j: (0, j)),
        ),
        compiler_params=pltpu.CompilerParams(
            dimension_semantics=("parallel",),               # megacore-shard on v7x
            vmem_limit_bytes=vmem_limit,
        ),
        cost_estimate=cost,
    )(x, prep.gamma, prep.beta, prep.w1t, prep.b1, prep.w2t, prep.b2)

    return out[:, :out_size]


# ---------------------------------------------------------------------------
# Pure-JAX reference (mirrors the PyTorch module in training mode)
# ---------------------------------------------------------------------------

def reference_forward(x, params):
    gamma, beta, w1, b1, w2, b2 = params
    mean = jnp.mean(x, axis=0, keepdims=True)
    var = jnp.mean((x - mean) ** 2, axis=0, keepdims=True)
    xn = (x - mean) / jnp.sqrt(var + BN_EPS) * gamma + beta
    h = xn @ w1.T + b1
    return h @ w2.T + b2


if __name__ == "__main__":
    # Small shapes consistent with the module (real model: 880 -> 100 -> 53539).
    # H=100 exercises the hidden-dim padding; O=777 exercises the output-dim
    # padding (53539 is likewise not a multiple of 128).
    B, D, H, O = 8, 112, 100, 777

    key = jax.random.PRNGKey(0)
    kx, kw1, kb1, kw2, kb2 = jax.random.split(key, 5)

    x = jax.random.normal(kx, (B, D), dtype=jnp.float32)

    # PyTorch-style init: BatchNorm defaults gamma=1 / beta=0, Linear uniform.
    gamma = jnp.ones((D,), dtype=jnp.float32)
    beta = jnp.zeros((D,), dtype=jnp.float32)
    lim1 = 1.0 / np.sqrt(D)
    w1 = jax.random.uniform(kw1, (H, D), jnp.float32, -lim1, lim1)
    b1 = jax.random.uniform(kb1, (H,), jnp.float32, -lim1, lim1)
    lim2 = 1.0 / np.sqrt(H)
    w2 = jax.random.uniform(kw2, (O, H), jnp.float32, -lim2, lim2)
    b2 = jax.random.uniform(kb2, (O,), jnp.float32, -lim2, lim2)

    params = (gamma, beta, w1, b1, w2, b2)
    ref = reference_forward(x, params)

    # --- f32-stream path: exact check against the reference -----------------
    prep32, out_size, tn32, vlim32 = prepare_params(
        params, batch_hint=B, w2_dtype=jnp.float32)
    out32 = jax.block_until_ready(
        neural_net_forward(x, prep32, out_size=out_size, tn=tn32, vmem_limit=vlim32))
    np.testing.assert_allclose(np.asarray(out32), np.asarray(ref),
                               rtol=1e-5, atol=1e-5)

    # --- bf16 weight-streaming path (production default): loose tolerance ---
    prep16, out_size, tn16, vlim16 = prepare_params(params, batch_hint=B)
    out16 = jax.block_until_ready(
        neural_net_forward(x, prep16, out_size=out_size, tn=tn16, vmem_limit=vlim16))
    np.testing.assert_allclose(np.asarray(out16), np.asarray(ref),
                               rtol=3e-2, atol=3e-2)

    print("KERNEL_OK")
</pallas_src>

<mosaic_0001>
module attributes {stable_mosaic.version = 11 : i64} {
  func.func @fused_kernel(%arg0: i32, %arg1: memref<8x112xf32, #tpu.memory_space<vmem>>, %arg2: memref<1x112xf32, #tpu.memory_space<vmem>>, %arg3: memref<1x112xf32, #tpu.memory_space<vmem>>, %arg4: memref<112x104xf32, #tpu.memory_space<vmem>>, %arg5: memref<1x104xf32, #tpu.memory_space<vmem>>, %arg6: memref<104x896xf32, #tpu.memory_space<vmem>>, %arg7: memref<1x896xf32, #tpu.memory_space<vmem>>, %arg8: memref<8x896xf32, #tpu.memory_space<vmem>>) attributes {dimension_semantics = [#tpu.dimension_semantics<parallel>], iteration_bounds = array<i64: 1>, scalar_prefetch = 0 : i64, scratch_operands = 0 : i64, tpu.core_type = #tpu.core_type<tc>, window_params = [{pipeline_mode = #tpu.pipeline_mode<synchronous>, transform_indices = @transform_0, window_bounds = array<i64: 8, 112>}, {pipeline_mode = #tpu.pipeline_mode<synchronous>, transform_indices = @transform_1, window_bounds = array<i64: 1, 112>}, {pipeline_mode = #tpu.pipeline_mode<synchronous>, transform_indices = @transform_2, window_bounds = array<i64: 1, 112>}, {pipeline_mode = #tpu.pipeline_mode<synchronous>, transform_indices = @transform_3, window_bounds = array<i64: 112, 104>}, {pipeline_mode = #tpu.pipeline_mode<synchronous>, transform_indices = @transform_4, window_bounds = array<i64: 1, 104>}, {transform_indices = @transform_5, window_bounds = array<i64: 104, 896>}, {transform_indices = @transform_6, window_bounds = array<i64: 1, 896>}, {transform_indices = @transform_7, window_bounds = array<i64: 8, 896>}]} {
    %c0 = arith.constant 0 : index
    %c0_0 = arith.constant 0 : index
    %0 = vector.load %arg1[%c0, %c0_0] : memref<8x112xf32, #tpu.memory_space<vmem>>, vector<8x112xf32>
    %cst = arith.constant dense<0.000000e+00> : vector<112xf32>
    %1 = vector.multi_reduction <add>, %0, %cst [0] : vector<8x112xf32> to vector<112xf32>
    %2 = vector.shape_cast %1 : vector<112xf32> to vector<1x112xf32>
    %cst_1 = arith.constant 8.000000e+00 : f32
    %3 = vector.broadcast %cst_1 : f32 to vector<1x112xf32>
    %4 = arith.divf %2, %3 : vector<1x112xf32>
    %5 = vector.broadcast %4 : vector<1x112xf32> to vector<8x112xf32>
    %6 = arith.subf %0, %5 : vector<8x112xf32>
    %7 = arith.mulf %6, %6 : vector<8x112xf32>
    %cst_2 = arith.constant dense<0.000000e+00> : vector<112xf32>
    %8 = vector.multi_reduction <add>, %7, %cst_2 [0] : vector<8x112xf32> to vector<112xf32>
    %9 = vector.shape_cast %8 : vector<112xf32> to vector<1x112xf32>
    %cst_3 = arith.constant 8.000000e+00 : f32
    %10 = vector.broadcast %cst_3 : f32 to vector<1x112xf32>
    %11 = arith.divf %9, %10 : vector<1x112xf32>
    %12 = vector.broadcast %4 : vector<1x112xf32> to vector<8x112xf32>
    %13 = arith.subf %0, %12 : vector<8x112xf32>
    %cst_4 = arith.constant 9.99999974E-6 : f32
    %14 = vector.broadcast %cst_4 : f32 to vector<1x112xf32>
    %15 = arith.addf %11, %14 : vector<1x112xf32>
    %16 = math.rsqrt %15 : vector<1x112xf32>
    %17 = vector.broadcast %16 : vector<1x112xf32> to vector<8x112xf32>
    %18 = arith.mulf %13, %17 : vector<8x112xf32>
    %c0_5 = arith.constant 0 : index
    %c0_6 = arith.constant 0 : index
    %19 = vector.load %arg2[%c0_5, %c0_6] : memref<1x112xf32, #tpu.memory_space<vmem>>, vector<1x112xf32>
    %20 = vector.broadcast %19 : vector<1x112xf32> to vector<8x112xf32>
    %21 = arith.mulf %18, %20 : vector<8x112xf32>
    %c0_7 = arith.constant 0 : index
    %c0_8 = arith.constant 0 : index
    %22 = vector.load %arg3[%c0_7, %c0_8] : memref<1x112xf32, #tpu.memory_space<vmem>>, vector<1x112xf32>
    %23 = vector.broadcast %22 : vector<1x112xf32> to vector<8x112xf32>
    %24 = arith.addf %21, %23 : vector<8x112xf32>
    %c0_9 = arith.constant 0 : index
    %c0_10 = arith.constant 0 : index
    %25 = vector.load %arg4[%c0_9, %c0_10] : memref<112x104xf32, #tpu.memory_space<vmem>>, vector<112x104xf32>
    %cst_11 = arith.constant dense<0.000000e+00> : vector<8x104xf32>
    %26 = tpu.matmul %24, %25, %cst_11 {dimension_numbers = #tpu.dot_dimension_numbers<[1], [0], [0], [1], [0, 0, 1, 1], [], []>} : vector<8x112xf32>, vector<112x104xf32>, vector<8x104xf32> -> vector<8x104xf32>
    %c0_12 = arith.constant 0 : index
    %c0_13 = arith.constant 0 : index
    %27 = vector.load %arg5[%c0_12, %c0_13] : memref<1x104xf32, #tpu.memory_space<vmem>>, vector<1x104xf32>
    %28 = vector.broadcast %27 : vector<1x104xf32> to vector<8x104xf32>
    %29 = arith.addf %26, %28 : vector<8x104xf32>
    %c0_14 = arith.constant 0 : index
    %c0_15 = arith.constant 0 : index
    %30 = vector.load %arg6[%c0_14, %c0_15] : memref<104x896xf32, #tpu.memory_space<vmem>>, vector<104x896xf32>
    %cst_16 = arith.constant dense<0.000000e+00> : vector<8x896xf32>
    %31 = tpu.matmul %29, %30, %cst_16 {dimension_numbers = #tpu.dot_dimension_numbers<[1], [0], [0], [1], [0, 0, 1, 1], [], []>} : vector<8x104xf32>, vector<104x896xf32>, vector<8x896xf32> -> vector<8x896xf32>
    %c0_17 = arith.constant 0 : index
    %c0_18 = arith.constant 0 : index
    %32 = vector.load %arg7[%c0_17, %c0_18] : memref<1x896xf32, #tpu.memory_space<vmem>>, vector<1x896xf32>
    %33 = vector.broadcast %32 : vector<1x896xf32> to vector<8x896xf32>
    %34 = arith.addf %31, %33 : vector<8x896xf32>
    %c0_19 = arith.constant 0 : index
    %c0_20 = arith.constant 0 : index
    %35 = vector.load %arg8[%c0_19, %c0_20] : memref<8x896xf32, #tpu.memory_space<vmem>>, vector<8x896xf32>
    tpu.vector_store %arg8[%c0_19, %c0_20], %34 {strides = array<i32>} : memref<8x896xf32, #tpu.memory_space<vmem>>, vector<8x896xf32>,
    return
  }
  func.func @transform_0(%arg0: i32) -> (i32, i32) {
    %c0_i32 = arith.constant 0 : i32
    %c0_i32_0 = arith.constant 0 : i32
    %c0_i32_1 = arith.constant 0 : i32
    return %c0_i32, %c0_i32_0 : i32, i32
  }
  func.func @transform_1(%arg0: i32) -> (i32, i32) {
    %c0_i32 = arith.constant 0 : i32
    %c0_i32_0 = arith.constant 0 : i32
    %c0_i32_1 = arith.constant 0 : i32
    return %c0_i32, %c0_i32_0 : i32, i32
  }
  func.func @transform_2(%arg0: i32) -> (i32, i32) {
    %c0_i32 = arith.constant 0 : i32
    %c0_i32_0 = arith.constant 0 : i32
    %c0_i32_1 = arith.constant 0 : i32
    return %c0_i32, %c0_i32_0 : i32, i32
  }
  func.func @transform_3(%arg0: i32) -> (i32, i32) {
    %c0_i32 = arith.constant 0 : i32
    %c0_i32_0 = arith.constant 0 : i32
    %c0_i32_1 = arith.constant 0 : i32
    return %c0_i32, %c0_i32_0 : i32, i32
  }
  func.func @transform_4(%arg0: i32) -> (i32, i32) {
    %c0_i32 = arith.constant 0 : i32
    %c0_i32_0 = arith.constant 0 : i32
    %c0_i32_1 = arith.constant 0 : i32
    return %c0_i32, %c0_i32_0 : i32, i32
  }
  func.func @transform_5(%arg0: i32) -> (i32, i32) {
    %c0_i32 = arith.constant 0 : i32
    %c0_i32_0 = arith.constant 0 : i32
    return %c0_i32, %arg0 : i32, i32
  }
  func.func @transform_6(%arg0: i32) -> (i32, i32) {
    %c0_i32 = arith.constant 0 : i32
    %c0_i32_0 = arith.constant 0 : i32
    return %c0_i32, %arg0 : i32, i32
  }
  func.func @transform_7(%arg0: i32) -> (i32, i32) {
    %c0_i32 = arith.constant 0 : i32
    %c0_i32_0 = arith.constant 0 : i32
    return %c0_i32, %arg0 : i32, i32
  }
}

</mosaic_0001>

<bundles_post_ra>
// kernel: neural_net_forward.1
= control target key start
LH: loop header
LB: loop body
LE: loop exit
PB: predicated region body
PF: predicated region fallthrough
CT: control target
= control target key end

     0   :  { %12 = vsyncpa [#allocation3], 0  ;;  %s1043_s0 = inlined_call_operand.vmem [shape: f32[8,112], index: 0, kind: input, shape index: {}]   ;;  %s1044_s1 = inlined_call_operand.vmem [shape: f32[1,112], index: 1, kind: input, shape index: {}]   ;;  %s1045_s2 = inlined_call_operand.vmem [shape: f32[1,112], index: 2, kind: input, shape index: {}]   ;;  %s1046_s3 = inlined_call_operand.vmem [shape: f32[112,104], index: 3, kind: input, shape index: {}]   ;;  %s1047_s4 = inlined_call_operand.vmem [shape: f32[1,104], index: 4, kind: input, shape index: {}]   ;;  %s1048_s5 = inlined_call_operand.hbm [shape: f32[104,896], index: 5, kind: input, shape index: {}]   ;;  %s1049_s6 = inlined_call_operand.vmem [shape: f32[1,896], index: 6, kind: input, shape index: {}]   ;;  %s1050_s7 = inlined_call_operand.hbm [shape: f32[8,896], index: 7, kind: output, shape index: {}]  }
   0x1   :  { %13 = vsyncpa [#allocation4], 0  ;;  %s877_s24 = smov [#allocation2]   ;;  %s829_s28 = scalar_lea.hbm %s1048_s5, 11648 }
   0x2   :  { %s29_s25 = sshll.u32 %s877_s24, 4  ;;  %p830_p0 = scmp.ne.s32.totalorder %s1048_s5, %s829_s28  ;;  %s30_s25 = int_to_ptr.vmem [resolvable:$true] %s29_s25 }
   0x3   :  { %p833_p1 = scmp.lt.u32.totalorder %s829_s28, %s1048_s5 }
   0x5   :  { %p835_p2 = pnand %p833_p1, %p830_p0 }
   0x7   :  { %838 = shalt.err (!%p835_p2)
}
   0x8   :  { %s839_s10 = scalar_lea.vmem %s30_s25, 11648  ;;  %p844_p4 = scmp.lt.s32.totalorder %s30_s25, %s30_s25 }
   0x9   :  { %p840_p3 = scmp.ne.s32.totalorder %s30_s25, %s839_s10  ;;  %p845_p5 = scmp.lt.s32.totalorder %s839_s10, %s839_s10 }
   0xb   :  { %p846_p6 = por %p845_p5, %p844_p4 }
   0xd   :  { %p847_p7 = pnand %p846_p6, %p840_p3 }
   0xf   :  { %850 = shalt.err (!%p847_p7)
}
  0x10   :  { %s878_s11 = smov 896   ;;  %s879_s12 = smov 56  }
  0x11   :  { %35 = dma.hbm_to_vmem [thread:$0]  %s1048_s5, 11648, %s30_s25, [#allocation3], %s878_s11, %s878_s11, %s879_s12  }
  0x12   :  { %873 = dma.done.wait [#allocation3], 11648  }
  0x13   :  { %874 = vsyncadd [#allocation3], 4294955648  ;;  %v880_v0 = vmov 0.0|0.0   ;;  %vm881_vm0 = vmmov 0   ;;  %v882_v1 = vmov 0.0   ;;  %v81_v2 = vld [vmem:[%s1046_s3] sm:$0xff] }
  0x14   :  { %709 = vmatprep.subr.bf16.mxu0 %v880_v0  ;;  %677 = vmatprep.mubr.msk.f32.mxu0 %vm881_vm0, %v882_v1  ;;  %v82_v3 = vld [vmem:[%s1046_s3 + $0x8] sm:$0xff]  ;;  %v83_v4 = vld [vmem:[%s1046_s3 + $0x10] sm:$0xff]  ;;  %v84_v6 = vld [vmem:[%s1046_s3 + $0x18] sm:$0xff]  ;;  %vm42_vm1 = vcmask 916480   ;;  %vm303_vm2 = vcmask 850944  }
  0x15   :  { %371 = vmatprep.mubr.f32.mxu1 %v882_v1  ;;  %v710_v5 = vpack.c.bf16 %v82_v3, %v81_v2  ;;  %v713_v7 = vpack.c.bf16 %v84_v6, %v83_v4  ;;  %v85_v8 = vld [vmem:[%s1046_s3 + $0x20] sm:$0xff]  ;;  %v86_v9 = vld [vmem:[%s1046_s3 + $0x28] sm:$0xff]  ;;  %v182_v16 = vld [vmem:[#allocation2 + $0x38] sm:$0xff] }
  0x16   :  { %v962_v10 = vld [vmem:[%s1043_s0] sm:$0xff]  ;;  %v176_v12 = vld [vmem:[#allocation2 + $0x8] sm:$0xff]  ;;  %v716_v17 = vpack.c.bf16 %v86_v9, %v85_v8  ;;  %v87_v18 = vld [vmem:[%s1046_s3 + $0x30] sm:$0xff] }
  0x17   :  { %711 = vmatpush3.bf16.msra.mxu0 %v710_v5  ;;  %v43_v11 = vsel %vm42_vm1, %v962_v10, 0.0  ;;  %v183_v14 = vld [vmem:[#allocation2 + $0x40] sm:$0xff]  ;;  %v88_v21 = vld [vmem:[%s1046_s3 + $0x38] sm:$0xff]  ;;  %v197_v24 = vld [vmem:[#allocation2 + $0xb0] sm:$0xff] }
  0x18   :  { %712 = vmatprep.subr.bf16.mxu0 %v880_v0  ;;  %v44_v13 = vrot.slane %v43_v11, 4  ;;  %v175_v15 = vld [vmem:[#allocation2] sm:$0xff]  ;;  %v730_v19 = vpack.c.bf16 %v183_v14, %v176_v12  ;;  %v190_v23 = vld [vmem:[#allocation2 + $0x78] sm:$0xff]  ;;  %v189_v26 = vld [vmem:[#allocation2 + $0x70] sm:$0xff]  ;;  %v719_v30 = vpack.c.bf16 %v88_v21, %v87_v18 }
  0x19   :  { %v732_v20 = vpack.c.bf16 %v182_v16, %v175_v15  ;;  %v734_v25 = vpack.c.bf16 %v197_v24, %v190_v23  ;;  %v196_v27 = vld [vmem:[#allocation2 + $0xa8] sm:$0xff]  ;;  %v211_v32 = vld [vmem:[#allocation2 + $0x120] sm:$0xff]  ;;  %v210_v38 = vld [vmem:[#allocation2 + $0x118] sm:$0xff] }
  0x1a   :  { %v45_v22 = vadd.f32 %v44_v13, %v43_v11  ;;  %731 = vmatprep.subr.bf16.mxu1 %v730_v19  ;;  %v736_v29 = vpack.c.bf16 %v196_v27, %v189_v26  ;;  %v204_v31 = vld [vmem:[#allocation2 + $0xe8] sm:$0xff]  ;;  %v203_v33 = vld [vmem:[#allocation2 + $0xe0] sm:$0xff]  ;;  %v218_v39 = vld [vmem:[#allocation2 + $0x158] sm:$0xff] }
  0x1b   :  { %714 = vmatpush3.bf16.msra.mxu0 %v713_v7  ;;  %733 = vmatpush1.bf16.msra.mxu1 %v732_v20  ;;  %v89_v34 = vld [vmem:[%s1046_s3 + $0x40] sm:$0xff]  ;;  %v90_v35 = vld [vmem:[%s1046_s3 + $0x48] sm:$0xff]  ;;  %v738_v37 = vpack.c.bf16 %v211_v32, %v204_v31  ;;  %v740_v41 = vpack.c.bf16 %v210_v38, %v203_v33  ;;  %v225_v42 = vld [vmem:[#allocation2 + $0x190] sm:$0xff] }
  0x1c   :  { %715 = vmatprep.subr.bf16.mxu0 %v880_v0  ;;  %v46_v28 = vrot.slane %v45_v22, 2  ;;  %735 = vmatprep.subr.bf16.mxu1 %v734_v25  ;;  %v722_v43 = vpack.c.bf16 %v90_v35, %v89_v34  ;;  %v91_v44 = vld [vmem:[%s1046_s3 + $0x50] sm:$0xff]  ;;  %v742_v45 = vpack.c.bf16 %v225_v42, %v218_v39  ;;  %v224_v47 = vld [vmem:[#allocation2 + $0x188] sm:$0xff]  ;;  %v92_v48 = vld [vmem:[%s1046_s3 + $0x58] sm:$0xff] }
  0x1d   :  { %v217_v46 = vld [vmem:[#allocation2 + $0x150] sm:$0xff]  ;;  %v232_v50 = vld [vmem:[#allocation2 + $0x1c8] sm:$0xff]  ;;  %v239_v51 = vld [vmem:[#allocation2 + $0x200] sm:$0xff]  ;;  %v725_v54 = vpack.c.bf16 %v92_v48, %v91_v44 }
  0x1e   :  { %v47_v36 = vadd.f32 %v46_v28, %v45_v22  ;;  %v744_v53 = vpack.c.bf16 %v224_v47, %v217_v46  ;;  %v93_v55 = vld [vmem:[%s1046_s3 + $0x60] sm:$0xff]  ;;  %v746_v56 = vpack.c.bf16 %v239_v51, %v232_v50  ;;  %v238_v58 = vld [vmem:[#allocation2 + $0x1f8] sm:$0xff]  ;;  %v94_v59 = vld [vmem:[%s1046_s3 + $0x68] sm:$0xff] }
  0x1f   :  { %717 = vmatpush3.bf16.msra.mxu0 %v716_v17  ;;  %737 = vmatpush1.bf16.msra.mxu1 %v736_v29  ;;  %v231_v57 = vld [vmem:[#allocation2 + $0x1c0] sm:$0xff]  ;;  %v246_v61 = vld [vmem:[#allocation2 + $0x238] sm:$0xff]  ;;  %v253_v62 = vld [vmem:[#allocation2 + $0x270] sm:$0xff]  ;;  %v728_v5 = vpack.c.bf16 %v94_v59, %v93_v55 }
  0x20   :  { %718 = vmatprep.subr.bf16.mxu0 %v880_v0  ;;  %v48_v40 = vrot.slane %v47_v36, 1  ;;  %739 = vmatprep.subr.bf16.mxu1 %v738_v37  ;;  %v180_v63 = vld [vmem:[#allocation2 + $0x28] sm:$0xff]  ;;  %v187_v2 = vld [vmem:[#allocation2 + $0x60] sm:$0xff]  ;;  %v748_v4 = vpack.c.bf16 %v238_v58, %v231_v57  ;;  %v750_v6 = vpack.c.bf16 %v253_v62, %v246_v61  ;;  %v245_v7 = vld [vmem:[#allocation2 + $0x230] sm:$0xff] }
  0x21   :  { %v252_v8 = vld [vmem:[#allocation2 + $0x268] sm:$0xff]  ;;  %v778_v11 = vpack.c.bf16 %v187_v2, %v180_v63  ;;  %v612_v21 = vld [vmem:[%s1044_s1] ss:$0 sm:$0xff]  ;;  %v186_v24 = vld [vmem:[#allocation2 + $0x58] sm:$0xff] }
  0x22   :  { %v49_v49 = vadd.f32 %v48_v40, %v47_v36  ;;  %v179_v23 = vld [vmem:[#allocation2 + $0x20] sm:$0xff]  ;;  %v194_v26 = vld [vmem:[#allocation2 + $0x98] sm:$0xff]  ;;  %v201_v27 = vld [vmem:[#allocation2 + $0xd0] sm:$0xff] }
  0x23   :  { %720 = vmatpush3.bf16.msra.mxu0 %v719_v30  ;;  %741 = vmatpush1.bf16.msra.mxu1 %v740_v41  ;;  %v613_v25 = vld [vmem:[%s1045_s2] ss:$0 sm:$0xff]  ;;  %v780_v29 = vpack.c.bf16 %v186_v24, %v179_v23  ;;  %v782_v31 = vpack.c.bf16 %v201_v27, %v194_v26  ;;  %v193_v32 = vld [vmem:[#allocation2 + $0x90] sm:$0xff]  ;;  %v200_v33 = vld [vmem:[#allocation2 + $0xc8] sm:$0xff] }
  0x24   :  { %721 = vmatprep.subr.bf16.mxu0 %v880_v0  ;;  %v51_v52 = vmul.f32 0.125, %v49_v49  ;;  %743 = vmatprep.subr.bf16.mxu1 %v742_v45  ;;  %v208_v34 = vld [vmem:[#allocation2 + $0x108] sm:$0xff]  ;;  %v215_v35 = vld [vmem:[#allocation2 + $0x140] sm:$0xff]  ;;  %v784_v36 = vpack.c.bf16 %v200_v33, %v193_v32  ;;  %v214_v39 = vld [vmem:[#allocation2 + $0x138] sm:$0xff] }
  0x25   :  { %v786_v37 = vpack.c.bf16 %v215_v35, %v208_v34  ;;  %v207_v38 = vld [vmem:[#allocation2 + $0x100] sm:$0xff]  ;;  %v222_v40 = vld [vmem:[#allocation2 + $0x178] sm:$0xff]  ;;  %v229_v41 = vld [vmem:[#allocation2 + $0x1b0] sm:$0xff] }
  0x26   :  { %v52_v60 = vsub.f32 %v962_v10, %v51_v52  ;;  %v752_v10 = vpack.c.bf16 %v252_v8, %v245_v7  ;;  %v788_v42 = vpack.c.bf16 %v214_v39, %v207_v38  ;;  %v221_v44 = vld [vmem:[#allocation2 + $0x170] sm:$0xff]  ;;  %v228_v45 = vld [vmem:[#allocation2 + $0x1a8] sm:$0xff]  ;;  %v243_v47 = vld [vmem:[#allocation2 + $0x220] sm:$0xff] }
  0x27   :  { %723 = vmatpush3.bf16.msra.mxu0 %v722_v43  ;;  %745 = vmatpush1.bf16.msra.mxu1 %v744_v53  ;;  %v790_v43 = vpack.c.bf16 %v229_v41, %v222_v40  ;;  %v236_v46 = vld [vmem:[#allocation2 + $0x1e8] sm:$0xff]  ;;  %v792_v48 = vpack.c.bf16 %v228_v45, %v221_v44  ;;  %v235_v50 = vld [vmem:[#allocation2 + $0x1e0] sm:$0xff]  ;;  %v242_v51 = vld [vmem:[#allocation2 + $0x218] sm:$0xff] }
  0x28   :  { %724 = vmatprep.subr.bf16.mxu0 %v880_v0  ;;  %v53_v3 = vmul.f32 %v52_v60, %v52_v60  ;;  %747 = vmatprep.subr.bf16.mxu1 %v746_v56  ;;  %v794_v49 = vpack.c.bf16 %v243_v47, %v236_v46  ;;  %v250_v52 = vld [vmem:[#allocation2 + $0x258] sm:$0xff]  ;;  %v257_v53 = vld [vmem:[#allocation2 + $0x290] sm:$0xff]  ;;  %v256_v57 = vld [vmem:[#allocation2 + $0x288] sm:$0xff] }
  0x29   :  { %v798_v55 = vpack.c.bf16 %v257_v53, %v250_v52  ;;  %v249_v56 = vld [vmem:[#allocation2 + $0x250] sm:$0xff]  ;;  %v260_v59 = vld [vmem:[#allocation2 + $0x2a8] sm:$0xff]  ;;  %v259_v62 = vld [vmem:[#allocation2 + $0x2a0] sm:$0xff] }
  0x2a   :  { %v54_v9 = vsel %vm42_vm1, %v53_v3, 0.0  ;;  %v800_v58 = vpack.c.bf16 %v256_v57, %v249_v56  ;;  %v185_v61 = vld [vmem:[#allocation2 + $0x50] sm:$0xff]  ;;  %v264_v63 = vld [vmem:[#allocation2 + $0x2c8] sm:$0xff]  ;;  %v263_v3 = vld [vmem:[#allocation2 + $0x2c0] sm:$0xff] }
  0x2b   :  { %726 = vmatpush3.bf16.msra.mxu0 %v725_v54  ;;  %v55_v12 = vrot.slane %v54_v9, 4  ;;  %749 = vmatpush1.bf16.msra.mxu1 %v748_v4  ;;  %v796_v54 = vpack.c.bf16 %v242_v51, %v235_v50  ;;  %v177_v4 = vld [vmem:[#allocation2 + $0x10] sm:$0xff]  ;;  %v192_v7 = vld [vmem:[#allocation2 + $0x88] sm:$0xff]  ;;  %v199_v8 = vld [vmem:[#allocation2 + $0xc0] sm:$0xff] }
  0x2c   :  { %727 = vmatprep.subr.bf16.mxu0 %v880_v0  ;;  %751 = vmatprep.subr.bf16.mxu1 %v750_v6  ;;  %v614_v6 = vld [vmem:[%s1047_s4] ss:$0 sm:$0xff]  ;;  %v226_v27 = vld [vmem:[#allocation2 + $0x198] sm:$0xff]  ;;  %v233_v32 = vld [vmem:[#allocation2 + $0x1d0] sm:$0xff] }
  0x2d   :  { %v56_v13 = vadd.f32 %v55_v12, %v54_v9  ;;  %v227_v23 = vld [vmem:[#allocation2 + $0x1a0] sm:$0xff]  ;;  %v240_v33 = vld [vmem:[#allocation2 + $0x208] sm:$0xff]  ;;  %v254_v39 = vld [vmem:[#allocation2 + $0x278] sm:$0xff] }
  0x2e   :  { %v219_v26 = vld [vmem:[#allocation2 + $0x160] sm:$0xff]  ;;  %v248_v34 = vld [vmem:[#allocation2 + $0x248] sm:$0xff]  ;;  %v262_v41 = vld [vmem:[#allocation2 + $0x2b8] sm:$0xff] }
  0x2f   :  { %729 = vmatpush3.bf16.msra.mxu0 %v728_v5  ;;  %v57_v14 = vrot.slane %v56_v13, 2  ;;  %753 = vmatpush1.bf16.msra.mxu1 %v752_v10  ;;  %v184_v5 = vld [vmem:[#allocation2 + $0x48] sm:$0xff]  ;;  %v255_v35 = vld [vmem:[#allocation2 + $0x280] sm:$0xff]  ;;  %v261_v44 = vld [vmem:[#allocation2 + $0x2b0] sm:$0xff] }
  0x30   :  { %779 = vmatprep.subr.bf16.mxu0 %v778_v11  ;;  %331 = vmatprep.subr.mxu1 %v260_v59  ;;  %v756_v11 = vpack.c.bf16 %v184_v5, %v177_v4  ;;  %v247_v38 = vld [vmem:[#allocation2 + $0x240] sm:$0xff]  ;;  %v202_v47 = vld [vmem:[#allocation2 + $0xd8] sm:$0xff]  ;;  %v216_v50 = vld [vmem:[#allocation2 + $0x148] sm:$0xff] }
  0x31   :  { %v58_v15 = vadd.f32 %v57_v14, %v56_v13  ;;  %v758_v13 = vpack.c.bf16 %v199_v8, %v192_v7  ;;  %v191_v14 = vld [vmem:[#allocation2 + $0x80] sm:$0xff]  ;;  %v776_v40 = vpack.c.bf16 %v254_v39, %v247_v38  ;;  %v230_v53 = vld [vmem:[#allocation2 + $0x1b8] sm:$0xff]  ;;  %v244_v56 = vld [vmem:[#allocation2 + $0x228] sm:$0xff] }
  0x32   :  { %v195_v46 = vld [vmem:[#allocation2 + $0xa0] sm:$0xff]  ;;  %v258_v59 = vld [vmem:[#allocation2 + $0x298] sm:$0xff] }
  0x33   :  { %v59_v16 = vrot.slane %v58_v15, 1  ;;  %332 = vmatpush1.msra.mxu1 %v259_v62  ;;  %v223_v52 = vld [vmem:[#allocation2 + $0x180] sm:$0xff]  ;;  %v268_v62 = vlaneseq }
  0x34   :  { %v266_v4 = vld [vmem:[%s1049_s6] sm:$0xff]  ;;  %s883_s6 = smov [#allocation5]  }
  0x35   :  { %v60_v17 = vadd.f32 %v59_v16, %v58_v15  ;;  %v198_v15 = vld [vmem:[#allocation2 + $0xb8] sm:$0xff]  ;;  %s603_s23 = sshll.u32 %s883_s6, 4  ;;  %s604_s23 = int_to_ptr.vmem [resolvable:$true] %s603_s23 }
  0x36   :  { %v206_v16 = vld [vmem:[#allocation2 + $0xf8] sm:$0xff]  ;;  %s851_s24 = scalar_lea.vmem %s604_s23, 896  ;;  %p856_p9 = scmp.lt.s32.totalorder %s604_s23, %s604_s23 }
  0x37   :  { %v61_v18 = vmul.f32 0.125, %v60_v17  ;;  %v213_v17 = vld [vmem:[#allocation2 + $0x130] sm:$0xff]  ;;  %p852_p8 = scmp.ne.s32.totalorder %s604_s23, %s851_s24  ;;  %p857_p10 = scmp.lt.s32.totalorder %s851_s24, %s851_s24 }
  0x39   :  { %v62_v19 = vadd.f32 1e-05, %v61_v18  ;;  %v760_v18 = vpack.c.bf16 %v198_v15, %v191_v14  ;;  %p858_p11 = por %p857_p10, %p856_p9 }
  0x3b   :  { %827 = vrsqrt.f32 %v62_v19  ;;  %v762_v19 = vpack.c.bf16 %v213_v17, %v206_v16  ;;  %p859_p12 = pnand %p858_p11, %p852_p8 }
  0x45   :  { %v828_v20 = vpop.eup %827 }
  0x46   :  { %v64_v22 = vmul.f32 %v828_v20, %v52_v60  ;;  %v178_v60 = vld [vmem:[#allocation2 + $0x18] sm:$0xff]  ;;  %v205_v20 = vld [vmem:[#allocation2 + $0xf0] sm:$0xff] }
  0x47   :  { %v754_v2 = vpack.c.bf16 %v185_v61, %v178_v60  ;;  %v265_v61 = vld [vmem:[#allocation2 + $0x2d0] sm:$0xff] }
  0x48   :  { %v72_v28 = vmul.f32 %v612_v21, %v64_v22  ;;  %v212_v21 = vld [vmem:[#allocation2 + $0x128] sm:$0xff] }
  0x49   :  { %755 = vmatprep.subr.bf16.mxu1 %v754_v2  ;;  %v220_v22 = vld [vmem:[#allocation2 + $0x168] sm:$0xff]  ;;  %v764_v24 = vpack.c.bf16 %v212_v21, %v205_v20 }
  0x4a   :  { %v80_v30 = vadd.f32 %v613_v25, %v72_v28  ;;  %v766_v25 = vpack.c.bf16 %v227_v23, %v220_v22  ;;  %v234_v28 = vld [vmem:[#allocation2 + $0x1d8] sm:$0xff] }
  0x4c   :  { %678 = vmatmul.mubr.msk.f32.vlgmr.msra.gmra.mrb[0].mxu0 %vm42_vm1, %v80_v30  ;;  %v768_v30 = vpack.c.bf16 %v226_v27, %v219_v26 }
  0x4d   :  { %781 = vmatpush1.bf16.msra.mxu0 %v780_v29  ;;  %513 = vmatprep.mubr.f32.mxu0 %v882_v1  ;;  %v241_v29 = vld [vmem:[#allocation2 + $0x210] sm:$0xff] }
  0x4e   :  { %783 = vmatprep.subr.bf16.mxu0 %v782_v31  ;;  %v770_v31 = vpack.c.bf16 %v241_v29, %v234_v28 }
  0x51   :  { %785 = vmatpush1.bf16.msra.mxu0 %v784_v36  ;;  %v772_v36 = vpack.c.bf16 %v240_v33, %v233_v32 }
  0x52   :  { %787 = vmatprep.subr.bf16.mxu0 %v786_v37  ;;  %v774_v37 = vpack.c.bf16 %v255_v35, %v248_v34 }
  0x55   :  { %789 = vmatpush1.bf16.msra.mxu0 %v788_v42  ;;  %v181_v42 = vld [vmem:[#allocation2 + $0x30] sm:$0xff] }
  0x56   :  { %791 = vmatprep.subr.bf16.mxu0 %v790_v43  ;;  %v188_v43 = vld [vmem:[#allocation2 + $0x68] sm:$0xff] }
  0x57   :  { %v803_v45 = vpack.c.bf16 %v188_v43, %v181_v42 }
  0x59   :  { %793 = vmatpush1.bf16.msra.mxu0 %v792_v48  ;;  %v806_v48 = vpack.c.bf16 %v202_v47, %v195_v46 }
  0x5a   :  { %795 = vmatprep.subr.bf16.mxu0 %v794_v49  ;;  %v209_v49 = vld [vmem:[#allocation2 + $0x110] sm:$0xff] }
  0x5b   :  { %v809_v51 = vpack.c.bf16 %v216_v50, %v209_v49 }
  0x5d   :  { %797 = vmatpush1.bf16.msra.mxu0 %v796_v54  ;;  %v812_v54 = vpack.c.bf16 %v230_v53, %v223_v52 }
  0x5e   :  { %799 = vmatprep.subr.bf16.mxu0 %v798_v55  ;;  %v237_v55 = vld [vmem:[#allocation2 + $0x1f0] sm:$0xff] }
  0x5f   :  { %v815_v57 = vpack.c.bf16 %v244_v56, %v237_v55 }
  0x61   :  { %801 = vmatpush1.bf16.msra.mxu0 %v800_v58  ;;  %v251_v58 = vld [vmem:[#allocation2 + $0x260] sm:$0xff] }
  0x62   :  { %473 = vmatprep.subr.mxu0 %v264_v63  ;;  %v818_v60 = vpack.c.bf16 %v258_v59, %v251_v58  ;;  %v269_v63 = vshrl.u32 %v268_v62, 7 }
  0x64   :  { %v270_v2 = vsub.s32 0, %v269_v63  ;;  %v274_v5 = vsub.s32 1, %v269_v63  ;;  %v278_v17 = vsub.s32 2, %v269_v63 }
  0x65   :  { %474 = vmatpush1.msra.mxu0 %v263_v3  ;;  %v286_v3 = vsub.s32 4, %v269_v63 }
  0x66   :  { %v271_v7 = vrot.slane %v266_v4, %v270_v2  ;;  %v275_v8 = vrot.slane %v266_v4, %v274_v5 }
 0x11f   :  { %v171_v9 = vpop.f32.mrb[0].mxu0 }
 0x120   :  { %v1008_v12 = vadd.f32 %v614_v6, %v171_v9  ;;  %v679_v10 = vpop.f32.mrb[1].mxu0  ;;  %v290_v6 = vsub.s32 5, %v269_v63 }
 0x122   :  { %616 = vmatmul.mubr.msk.f32.vlgmr.msra.gmra.mrb[0].mxu1 %vm303_vm2, %v1008_v12  ;;  %618 = vmatmul.mubr.msk.f32.vlgmr.msra.gmra.mrb[2].mxu0 %vm303_vm2, %v1008_v12  ;;  %v291_v9 = vrot.slane %v266_v4, %v290_v6 }
 0x123   :  { %757 = vmatpush1.bf16.msra.mxu1 %v756_v11  ;;  %442 = vmatprep.mubr.f32.mxu1 %v882_v1 }
 0x124   :  { %759 = vmatprep.subr.bf16.mxu1 %v758_v13 }
 0x127   :  { %761 = vmatpush1.bf16.msra.mxu1 %v760_v18  ;;  %v282_v18 = vsub.s32 3, %v269_v63 }
 0x128   :  { %763 = vmatprep.subr.bf16.mxu1 %v762_v19  ;;  %v279_v19 = vrot.slane %v266_v4, %v278_v17 }
 0x129   :  { %v283_v20 = vrot.slane %v266_v4, %v282_v18 }
 0x12b   :  { %765 = vmatpush1.bf16.msra.mxu1 %v764_v24 }
 0x12c   :  { %767 = vmatprep.subr.bf16.mxu1 %v766_v25  ;;  %v294_v25 = vsub.s32 6, %v269_v63 }
 0x12e   :  { %v295_v26 = vrot.slane %v266_v4, %v294_v25 }
 0x12f   :  { %769 = vmatpush1.bf16.msra.mxu1 %v768_v30 }
 0x130   :  { %771 = vmatprep.subr.bf16.mxu1 %v770_v31 }
 0x133   :  { %773 = vmatpush1.bf16.msra.mxu1 %v772_v36 }
 0x134   :  { %775 = vmatprep.subr.bf16.mxu1 %v774_v37 }
 0x137   :  { %777 = vmatpush1.bf16.msra.mxu1 %v776_v40 }
 0x138   :  { %402 = vmatprep.subr.mxu1 %v262_v41 }
 0x13b   :  { %403 = vmatpush1.msra.mxu1 %v261_v44 }
 0x13c   :  { %617 = vmatmul.mubr.msk.f32.vlgmr.msra.gmra.mrb[2].mxu1 %vm303_vm2, %v1008_v12  ;;  %802 = vmatprep.subr.bf16.mxu1 %v880_v0 }
 0x13d   :  { %804 = vmatpush3.bf16.msra.mxu1 %v803_v45  ;;  %706 = vmatprep.mubr.msk.f32.mxu1 %vm881_vm0, %v882_v1 }
 0x13e   :  { %805 = vmatprep.subr.bf16.mxu1 %v880_v0 }
 0x141   :  { %807 = vmatpush3.bf16.msra.mxu1 %v806_v48 }
 0x142   :  { %808 = vmatprep.subr.bf16.mxu1 %v880_v0 }
 0x145   :  { %810 = vmatpush3.bf16.msra.mxu1 %v809_v51 }
 0x146   :  { %811 = vmatprep.subr.bf16.mxu1 %v880_v0 }
 0x149   :  { %813 = vmatpush3.bf16.msra.mxu1 %v812_v54 }
 0x14a   :  { %814 = vmatprep.subr.bf16.mxu1 %v880_v0 }
 0x14d   :  { %816 = vmatpush3.bf16.msra.mxu1 %v815_v57 }
 0x14e   :  { %817 = vmatprep.subr.bf16.mxu1 %v880_v0  ;;  %v287_v0 = vrot.slane %v266_v4, %v286_v3 }
 0x151   :  { %819 = vmatpush3.bf16.msra.mxu1 %v818_v60 }
 0x152   :  { %704 = vmatprep.subr.mxu1 %v882_v1 }
 0x155   :  { %705 = vmatpush3.msra.mxu1 %v265_v61 }
 0x156   :  { %707 = vmatmul.mubr.msk.f32.vlgmr.msra.gmra.mrb[4].mxu1 %vm303_vm2, %v1008_v12 }
 0x1f5   :  { %v373_v1 = vpop.f32.mrb[0].mxu1  ;;  %v515_v11 = vpop.f32.mrb[2].mxu0 }
 0x1f6   :  { %v374_v10 = vadd.f32 %v373_v1, %v271_v7  ;;  %v516_v13 = vadd.f32 %v515_v11, %v287_v0  ;;  %v375_v14 = vpop.f32.mrb[1].mxu1  ;;  %v517_v12 = vpop.f32.mrb[3].mxu0 }
 0x1f7   :  { %v376_v15 = vadd.f32 %v375_v14, %v275_v8  ;;  %v518_v16 = vadd.f32 %v517_v12, %v291_v9 }
 0x1f8   :  { %590 = vst [vmem:[#allocation5] sm:$0xff] %v374_v10  ;;  %594 = vst [vmem:[#allocation5 + $0x20] sm:$0xff] %v516_v13 }
 0x1f9   :  { %591 = vst [vmem:[#allocation5 + $0x8] sm:$0xff] %v376_v15  ;;  %595 = vst [vmem:[#allocation5 + $0x28] sm:$0xff] %v518_v16 }
 0x20f   :  { %v444_v21 = vpop.f32.mrb[2].mxu1 }
 0x210   :  { %v445_v22 = vadd.f32 %v444_v21, %v279_v19  ;;  %v446_v23 = vpop.f32.mrb[3].mxu1 }
 0x211   :  { %v447_v24 = vadd.f32 %v446_v23, %v283_v20 }
 0x212   :  { %592 = vst [vmem:[#allocation5 + $0x10] sm:$0xff] %v445_v22 }
 0x213   :  { %593 = vst [vmem:[#allocation5 + $0x18] sm:$0xff] %v447_v24 }
 0x229   :  { %v586_v27 = vpop.f32.mrb[4].mxu1 }
 0x22a   :  { %v587_v28 = vadd.f32 %v586_v27, %v295_v26  ;;  %v708_v29 = vpop.f32.mrb[5].mxu1 }
 0x22c   :  { %596 = vst [vmem:[#allocation5 + $0x30] sm:$0xff] %v587_v28 }
 0x22d   :  { %862 = shalt.err (!%p859_p12)
}
 0x22e   :  { %s863_s27 = scalar_lea.hbm %s1050_s7, 896 }
 0x22f   :  { %p864_p13 = scmp.ne.s32.totalorder %s1050_s7, %s863_s27  ;;  %p867_p0 = scmp.lt.u32.totalorder %s863_s27, %s1050_s7 }
 0x231   :  { %p869_p1 = pnand %p867_p0, %p864_p13 }
 0x233   :  { %872 = shalt.err (!%p869_p1)
}
 0x234   :  { %606 = dma.vmem_to_hbm [thread:$0]  %s604_s23, 896, %s1050_s7, [#allocation4]  }
 0x235   :  { %875 = dma.done.wait [#allocation4], 896  }
 0x236   :  { %876 = vsyncadd [#allocation4], 4294966400 }
 0x237   :  { %610 = vsyncpa [#allocation3], 1 }
 0x238   :  { %611 = vsyncpa [#allocation4], 1 }

</bundles_post_ra>
